<compile_context>
chip_gen: v6e
topology: v6e:2x2x1
jax: 0.10.0
libtpu: 0.0.40
codegen_flags: <defaults>
</compile_context>

<pallas_src>
import math

import jax
import jax.numpy as jnp
from jax.experimental import pallas as pl
from jax.experimental.pallas import tpu as pltpu


def _cdiv(a, b):
    return -(-a // b)


def _round_up(a, b):
    return _cdiv(a, b) * b


# ----------------------------------------------------------------------------
# Kernel factory: whole MLP chain for one column-tile of points.
#   refs = (x_ref, w0_ref, ..., wL_ref, o_ref)
#   x_ref: (d_in, tile_n); w_i: torch-layout (out_i, in_i); o_ref: (d_out, tile_n)
# ----------------------------------------------------------------------------
def _make_mlp_kernel(n_layers, compute_dtype, vpu_first_layer):
    def kernel(*refs):
        x_ref, *w_refs, o_ref = refs

        # ---- layer 0 --------------------------------------------------------
        if vpu_first_layer:
            # d_in is tiny (e.g. 3): a K=3 contraction wastes a full MXU
            # push-stream while the VALU sits idle, so compute layer 0 as
            # d_in broadcast FMAs on the VPU (slot rebalancing, ~free).
            x = x_ref[...].astype(jnp.float32)                  # (d_in, t)
            w0 = w_refs[0][...].astype(jnp.float32)             # (d0, d_in)
            d_in = x.shape[0]
            h = w0[:, 0:1] * x[0:1, :]                          # (d0, t)
            for k in range(1, d_in):
                h = h + w0[:, k:k + 1] * x[k:k + 1, :]
        else:
            h = jnp.dot(w_refs[0][...], x_ref[...],
                        preferred_element_type=jnp.float32)
        if n_layers > 1:                                        # ReLU after layer 0
            h = jnp.maximum(h, 0.0)

        # ---- layers 1..L-1 on the MXU (compute_dtype operands, f32 accum) ---
        for i in range(1, n_layers):
            h = jnp.dot(w_refs[i][...], h.astype(compute_dtype),
                        preferred_element_type=jnp.float32)
            if i < n_layers - 1:        # ReLU after every layer but the last
                h = jnp.maximum(h, 0.0)

        o_ref[...] = h.astype(o_ref.dtype)

    return kernel


def _pick_tile(n_points, tile_n_cap, min_tile=512, min_tiles=2):
    """Pick the column-tile size.

    Large tiles amortize the ~0.35 us per-grid-step overhead; but keep at
    least `min_tiles` grid steps when N allows it so the "parallel" grid axis
    can feed both v7x TensorCores.  Tile is a multiple of 128 (lane dim).
    """
    cap = max(128, (int(tile_n_cap) // 128) * 128)
    balanced = _round_up(max(1, _cdiv(int(n_points), min_tiles)), 128)
    return min(cap, max(min_tile, balanced))


# ----------------------------------------------------------------------------
# Primary entry point: feature-major, no layout plumbing at all.
# ----------------------------------------------------------------------------
def mlp_forward_t(x_t, weights, *, tile_n=16384, compute_dtype=jnp.bfloat16):
    """x_t: (n_input_dims, N); weights: torch-layout (out, in) f32 matrices.
    Returns (n_output_dims, N) float32 (e.g. sdf = out[0], deform = out[1:4])."""
    d_in, N = int(x_t.shape[0]), int(x_t.shape[1])
    d_out = int(weights[-1].shape[0])
    assert int(weights[0].shape[1]) == d_in

    tile_n = _pick_tile(N, tile_n)
    n_tiles = _cdiv(N, tile_n)   # ragged final block -> masked boundary writes

    # torch casts the input to float32; bf16 mode additionally rounds the
    # matmul operands (accumulation stays f32 inside the kernel).
    x_call = x_t.astype(jnp.float32).astype(compute_dtype)
    w_call = [w.astype(jnp.float32).astype(compute_dtype) for w in weights]

    # Weights: tiny, constant-index blocks -> DMA'd once, resident in VMEM.
    w_specs = [pl.BlockSpec(w.shape, lambda i: (0, 0)) for w in w_call]

    grid_spec = pltpu.PrefetchScalarGridSpec(
        num_scalar_prefetch=0,
        grid=(n_tiles,),
        in_specs=[pl.BlockSpec((d_in, tile_n), lambda i: (0, i))] + w_specs,
        out_specs=pl.BlockSpec((d_out, tile_n), lambda i: (0, i)),
    )

    flops = 2 * N * sum(int(w.shape[0]) * int(w.shape[1]) for w in weights)
    bytes_accessed = int(
        x_call.size * x_call.dtype.itemsize
        + sum(int(w.size) * w.dtype.itemsize for w in w_call)
        + N * d_out * 4
    )
    cost = pl.CostEstimate(flops=int(flops), transcendentals=0,
                           bytes_accessed=bytes_accessed)

    kernel = _make_mlp_kernel(
        n_layers=len(weights),
        compute_dtype=compute_dtype,
        vpu_first_layer=(d_in <= 8),
    )

    out_t = pl.pallas_call(
        kernel,
        out_shape=jax.ShapeDtypeStruct((d_out, N), jnp.float32),
        grid_spec=grid_spec,
        compiler_params=pltpu.CompilerParams(
            dimension_semantics=("parallel",),   # shards tiles across v7x TCs
            vmem_limit_bytes=32 * 1024 * 1024,   # safe on v5e/v6e/v7x
        ),
        cost_estimate=cost,
    )(x_call, *w_call)

    return out_t                                              # (d_out, N)


# ----------------------------------------------------------------------------
# Drop-in (N, d_in) -> (N, d_out) wrapper matching the torch module layout.
# The two transposes below are pure layout compatibility; pipelines that can
# consume feature-major data should call mlp_forward_t and skip both HBM
# transpose passes entirely.
# ----------------------------------------------------------------------------
def mlp_forward(x, weights, *, tile_n=16384, compute_dtype=jnp.bfloat16):
    out_t = mlp_forward_t(jnp.transpose(x), weights,
                          tile_n=tile_n, compute_dtype=compute_dtype)
    return jnp.transpose(out_t)                               # (N, d_out)


# ----------------------------------------------------------------------------
# Parameter init: torch.nn.init.kaiming_uniform_(weight, nonlinearity='relu')
#   bound = gain * sqrt(3 / fan_in), gain(relu) = sqrt(2)  =>  sqrt(6 / fan_in)
# Weights kept in torch-native (out_features, in_features) layout.
# ----------------------------------------------------------------------------
def init_mlp_params(key, cfg):
    dims = ([cfg["n_input_dims"]]
            + [cfg["n_neurons"]] * cfg["n_hidden_layers"]
            + [cfg["n_output_dims"]])
    weights = []
    for fan_in, fan_out in zip(dims[:-1], dims[1:]):
        key, sub = jax.random.split(key)
        bound = math.sqrt(6.0 / fan_in)
        w = jax.random.uniform(sub, (fan_out, fan_in), dtype=jnp.float32,
                               minval=-bound, maxval=bound)
        weights.append(w)
    return weights


# ----------------------------------------------------------------------------
# Pure-JAX reference for verification (torch-layout weights: h @ W.T).
# ----------------------------------------------------------------------------
def mlp_reference(x, weights):
    h = x.astype(jnp.float32)
    for i, w in enumerate(weights):
        h = h @ w.T
        if i < len(weights) - 1:
            h = jnp.maximum(h, 0.0)
    return h


if __name__ == "__main__":
    # DMTet-style config: 3-D positions in, SDF + 3-D deformation out.
    cfg = {
        "n_input_dims": 3,
        "n_neurons": 32,
        "n_hidden_layers": 2,
        "n_output_dims": 4,
    }

    key = jax.random.PRNGKey(0)
    wkey, xkey = jax.random.split(key)
    weights = init_mlp_params(wkey, cfg)

    # Deliberately NOT a multiple of the chosen tile: exercises the ragged
    # final block (masked boundary writes) and yields 2 grid steps.
    N = 1000
    x = jax.random.normal(xkey, (N, cfg["n_input_dims"]), dtype=jnp.float32)

    ref = mlp_reference(x, weights)

    # Exact float32 path (matches the torch float32 forward semantics).
    out_f32 = jax.block_until_ready(
        mlp_forward(x, weights, compute_dtype=jnp.float32))
    assert out_f32.shape == (N, cfg["n_output_dims"])
    assert out_f32.dtype == jnp.float32
    assert jnp.allclose(out_f32, ref, atol=1e-4, rtol=1e-4), "f32 mismatch"

    # Default bf16-MXU path (f32 accumulation): fast path, looser tolerance.
    out_bf16 = jax.block_until_ready(mlp_forward(x, weights))
    assert out_bf16.shape == (N, cfg["n_output_dims"])
    assert out_bf16.dtype == jnp.float32
    assert jnp.allclose(out_bf16, ref, atol=3e-1, rtol=5e-2), "bf16 mismatch"

    print("KERNEL_OK")
</pallas_src>

<mosaic_0001>
module attributes {stable_mosaic.version = 11 : i64} {
  func.func @kernel(%arg0: i32, %arg1: memref<3x512xf32, #tpu.memory_space<vmem>>, %arg2: memref<32x3xf32, #tpu.memory_space<vmem>>, %arg3: memref<32x32xf32, #tpu.memory_space<vmem>>, %arg4: memref<4x32xf32, #tpu.memory_space<vmem>>, %arg5: memref<4x512xf32, #tpu.memory_space<vmem>>) attributes {dimension_semantics = [#tpu.dimension_semantics<parallel>], iteration_bounds = array<i64: 2>, scalar_prefetch = 0 : i64, scratch_operands = 0 : i64, tpu.core_type = #tpu.core_type<tc>, window_params = [{transform_indices = @transform_0, window_bounds = array<i64: 3, 512>}, {pipeline_mode = #tpu.pipeline_mode<synchronous>, transform_indices = @transform_1, window_bounds = array<i64: 32, 3>}, {pipeline_mode = #tpu.pipeline_mode<synchronous>, transform_indices = @transform_2, window_bounds = array<i64: 32, 32>}, {pipeline_mode = #tpu.pipeline_mode<synchronous>, transform_indices = @transform_3, window_bounds = array<i64: 4, 32>}, {transform_indices = @transform_4, window_bounds = array<i64: 4, 512>}]} {
    %c0 = arith.constant 0 : index
    %c0_0 = arith.constant 0 : index
    %0 = vector.load %arg1[%c0, %c0_0] : memref<3x512xf32, #tpu.memory_space<vmem>>, vector<3x512xf32>
    %c0_1 = arith.constant 0 : index
    %c0_2 = arith.constant 0 : index
    %1 = vector.load %arg2[%c0_1, %c0_2] : memref<32x3xf32, #tpu.memory_space<vmem>>, vector<32x3xf32>
    %2 = vector.extract_strided_slice %1 {offsets = [0, 0], sizes = [32, 1], strides = [1, 1]} : vector<32x3xf32> to vector<32x1xf32>
    %3 = vector.extract_strided_slice %0 {offsets = [0, 0], sizes = [1, 512], strides = [1, 1]} : vector<3x512xf32> to vector<1x512xf32>
    %4 = vector.broadcast %2 : vector<32x1xf32> to vector<32x512xf32>
    %5 = vector.broadcast %3 : vector<1x512xf32> to vector<32x512xf32>
    %6 = arith.mulf %4, %5 : vector<32x512xf32>
    %7 = vector.extract_strided_slice %1 {offsets = [0, 1], sizes = [32, 1], strides = [1, 1]} : vector<32x3xf32> to vector<32x1xf32>
    %8 = vector.extract_strided_slice %0 {offsets = [1, 0], sizes = [1, 512], strides = [1, 1]} : vector<3x512xf32> to vector<1x512xf32>
    %9 = vector.broadcast %7 : vector<32x1xf32> to vector<32x512xf32>
    %10 = vector.broadcast %8 : vector<1x512xf32> to vector<32x512xf32>
    %11 = arith.mulf %9, %10 : vector<32x512xf32>
    %12 = arith.addf %6, %11 : vector<32x512xf32>
    %13 = vector.extract_strided_slice %1 {offsets = [0, 2], sizes = [32, 1], strides = [1, 1]} : vector<32x3xf32> to vector<32x1xf32>
    %14 = vector.extract_strided_slice %0 {offsets = [2, 0], sizes = [1, 512], strides = [1, 1]} : vector<3x512xf32> to vector<1x512xf32>
    %15 = vector.broadcast %13 : vector<32x1xf32> to vector<32x512xf32>
    %16 = vector.broadcast %14 : vector<1x512xf32> to vector<32x512xf32>
    %17 = arith.mulf %15, %16 : vector<32x512xf32>
    %18 = arith.addf %12, %17 : vector<32x512xf32>
    %cst = arith.constant 0.000000e+00 : f32
    %19 = vector.broadcast %cst : f32 to vector<32x512xf32>
    %20 = arith.maximumf %18, %19 : vector<32x512xf32>
    %c0_3 = arith.constant 0 : index
    %c0_4 = arith.constant 0 : index
    %21 = vector.load %arg3[%c0_3, %c0_4] : memref<32x32xf32, #tpu.memory_space<vmem>>, vector<32x32xf32>
    %cst_5 = arith.constant dense<0.000000e+00> : vector<32x512xf32>
    %22 = tpu.matmul %21, %20, %cst_5 {dimension_numbers = #tpu.dot_dimension_numbers<[1], [0], [0], [1], [0, 0, 1, 1], [], []>} : vector<32x32xf32>, vector<32x512xf32>, vector<32x512xf32> -> vector<32x512xf32>
    %cst_6 = arith.constant 0.000000e+00 : f32
    %23 = vector.broadcast %cst_6 : f32 to vector<32x512xf32>
    %24 = arith.maximumf %22, %23 : vector<32x512xf32>
    %c0_7 = arith.constant 0 : index
    %c0_8 = arith.constant 0 : index
    %25 = vector.load %arg4[%c0_7, %c0_8] : memref<4x32xf32, #tpu.memory_space<vmem>>, vector<4x32xf32>
    %cst_9 = arith.constant dense<0.000000e+00> : vector<4x512xf32>
    %26 = tpu.matmul %25, %24, %cst_9 {dimension_numbers = #tpu.dot_dimension_numbers<[1], [0], [0], [1], [0, 0, 1, 1], [], []>} : vector<4x32xf32>, vector<32x512xf32>, vector<4x512xf32> -> vector<4x512xf32>
    %c0_10 = arith.constant 0 : index
    %c0_11 = arith.constant 0 : index
    %27 = vector.load %arg5[%c0_10, %c0_11] : memref<4x512xf32, #tpu.memory_space<vmem>>, vector<4x512xf32>
    tpu.vector_store %arg5[%c0_10, %c0_11], %26 {strides = array<i32>} : memref<4x512xf32, #tpu.memory_space<vmem>>, vector<4x512xf32>,
    return
  }
  func.func @transform_0(%arg0: i32) -> (i32, i32) {
    %c0_i32 = arith.constant 0 : i32
    %c0_i32_0 = arith.constant 0 : i32
    return %c0_i32, %arg0 : i32, i32
  }
  func.func @transform_1(%arg0: i32) -> (i32, i32) {
    %c0_i32 = arith.constant 0 : i32
    %c0_i32_0 = arith.constant 0 : i32
    %c0_i32_1 = arith.constant 0 : i32
    return %c0_i32, %c0_i32_0 : i32, i32
  }
  func.func @transform_2(%arg0: i32) -> (i32, i32) {
    %c0_i32 = arith.constant 0 : i32
    %c0_i32_0 = arith.constant 0 : i32
    %c0_i32_1 = arith.constant 0 : i32
    return %c0_i32, %c0_i32_0 : i32, i32
  }
  func.func @transform_3(%arg0: i32) -> (i32, i32) {
    %c0_i32 = arith.constant 0 : i32
    %c0_i32_0 = arith.constant 0 : i32
    %c0_i32_1 = arith.constant 0 : i32
    return %c0_i32, %c0_i32_0 : i32, i32
  }
  func.func @transform_4(%arg0: i32) -> (i32, i32) {
    %c0_i32 = arith.constant 0 : i32
    %c0_i32_0 = arith.constant 0 : i32
    return %c0_i32, %arg0 : i32, i32
  }
}

</mosaic_0001>

<bundles_post_ra>
// kernel: tpu_custom_call.1
= control target key start
LH: loop header
LB: loop body
LE: loop exit
PB: predicated region body
PF: predicated region fallthrough
CT: control target
= control target key end

     0   :  { %9 = vsyncpa [#allocation3], 0  ;;  %s1371_s0 = inlined_call_operand.vmem [shape: f32[3,1000], index: 0, kind: input, shape index: {}]   ;;  %s1372_s1 = inlined_call_operand.vmem [shape: f32[32,3], index: 1, kind: input, shape index: {}]   ;;  %s1373_s2 = inlined_call_operand.hbm [shape: f32[32,32], index: 2, kind: input, shape index: {}]   ;;  %s1374_s3 = inlined_call_operand.vmem [shape: f32[4,32], index: 3, kind: input, shape index: {}]   ;;  %s1375_s4 = inlined_call_operand.hbm [shape: f32[4,1000], index: 4, kind: output, shape index: {}]  }
   0x1   :  { %10 = vsyncpa [#allocation4], 0 }
   0x2   :  { %12 = vsyncpa [#allocation4 + $0x1], 0  ;;  %s1148_s15 = smov 0   ;;  %s1150_s16 = smov 0  }
   0x3   :  { %s1152_s17 = smov 0   ;;  %s1154_s18 = smov 0  }
   0x4 LB: > { %s1169_s19 = sadd.s32 4294967295, %s1113_s18   ;;  %s931_s20 = sadd.s32 4294967294, %s1113_s18   ;;  %s1113_s18 = sphi %s1154_s18, %s1383_s18   ;;  %s1109_s17 = sphi %s1152_s17, %s1382_s17   ;;  %s1105_s16 = sphi %s1150_s16, %s1381_s16   ;;  %s1101_s15 = sphi %s1148_s15, %s1380_s15  }
   0x5   : > { %s1173_s21 = sadd.s32 1, %s1113_s18   ;;  %s114_s22 = sadd.s32 1, %s1109_s17 }
   0x6   : > { %s111_s23 = ssub.s32 %s1113_s18, %s1173_s21  ;;  %p124_p0 = scmp.ne.s32.totalorder %s1109_s17, %s1105_s16 }
   0x7   : > { %p112_p1 = scmp.eq.s32.totalorder %s111_s23, 0  ;;  %p125_p2 = scmp.eq.s32.totalorder %s1169_s19, 1 }
   0x8   : > { %p130_p3 = scmp.ne.s32.totalorder %s1105_s16, %s1101_s15  ;;  %p131_p4 = scmp.eq.s32.totalorder %s931_s20, 1 }
   0x9   : > { %s1184_s24 = scalar_select %p112_p1, %s1109_s17, %s114_s22  }
   0xa   : > { %p1186_p5 = por %p125_p2, %p124_p0  ;;  %p1190_p6 = por %p131_p4, %p130_p3 }
   0xb   : > { %p932_p7 = scmp.ge.s32.totalorder %s1113_s18, 1  ;;  %p138_p8 = scmp.lt.s32.totalorder %s1113_s18, 3 }
   0xc   : > { %s1377_s26 = scalar_select %p1190_p6, 1, 0 }
   0xd   : > { %p970_p9 = scmp.eq.s32.totalorder %s1169_s19, 0  ;;  %p1197_p10 = pnand %p932_p7, %p138_p8 }
   0xe   : > { %s1115_s28 = smov [#allocation2]  }
   0xf   : > { %s153_s29 = sshll.u32 %s1115_s28, 4  ;;  %p962_p11 = pneg %p1197_p10  ;;  %s154_s29 = int_to_ptr.vmem [resolvable:$true] %s153_s29 }
  0x10   : > { %s1034_s30 = scalar_lea.vmem %s154_s29, 512  ;;  %p1042_p3 = scmp.lt.s32.totalorder %s154_s29, %s154_s29 }
  0x11   : > { %p963_p12 = pnand %p970_p9, %p962_p11  ;;  %p1035_p0 = scmp.ne.s32.totalorder %s154_s29, %s1034_s30 }
  0x12   : > { %p1043_p4 = scmp.lt.s32.totalorder %s1034_s30, %s1034_s30 }
  0x13   : > { %p1025_p13 = pneg %p963_p12 }
  0x14   : > { %p1044_p6 = por %p1043_p4, %p1042_p3 }
  0x15   : > { %p1037_p1 = pnand %p1035_p0, %p1025_p13 }
  0x17   : > { %p1038_p2 = pneg %p1037_p1 }
  0x19   : > { %p1045_p7 = pnand %p1044_p6, %p1038_p2 }
  0x1b   : > { %1048 = shalt.err (!%p1045_p7)
}
  0x1c   : > { %s1116_s5 = smov 128   ;;  %s1117_s6 = smov 8  }
  0x1d   : > { %965 = dma.hbm_to_vmem [thread:$0]  (!%p963_p12), %s1373_s2, 512, %s154_s29, [#allocation3], %s1116_s5, %s1116_s5, %s1117_s6  }
  0x1e   : > { %181 = sbr.rel (%p1197_p10) target bundleno = 627 (0x273), region = 36 }
  0x23   : > { %1092 = dma.done.wait (%p970_p9), [#allocation3], 512  }
  0x24   : > { %1094 = vsyncadd (%p970_p9), [#allocation3], 4294966784  ;;  %v1118_v0 = vmov 0   ;;  %v219_v1 = vld [vmem:[%s1372_s1 + $0x18] sm:$0xff]  ;;  %v218_v2 = vld [vmem:[%s1372_s1 + $0x10] sm:$0xff]  ;;  %v1119_v3 = vmov 1   ;;  %v242_v8 = vlaneseq }
  0x25   : > { %1014 = vset.pattern.permute.xlu1 %v1118_v0  ;;  %1012 = vset.pattern.permute.xlu0 %v1118_v0  ;;  %v217_v4 = vld [vmem:[%s1372_s1 + $0x8] sm:$0xff]  ;;  %v1120_v5 = vmov 2   ;;  %v216_v6 = vld [vmem:[%s1372_s1] sm:$0xff]  ;;  %v1121_v7 = vmov 0.0   ;;  %s938_s23 = sshll.u32 %s1169_s19, 2  ;;  %vm482_vm0 = vcmask 261120  }
  0x26   : > { %237 = vperm.xlu0 %1012, %v219_v1   ;;  %232 = vperm.xlu1 %1014, %v218_v2   ;;  %p208_p6 = scmp.lt.s32.totalorder %s938_s23, 7  ;;  %v243_v9 = vshrl.u32 %v242_v8, 7  ;;  %s204_s7 = sand.u32 1, %s1105_s16  }
  0x27   : > { %559 = vmatprep.mubr.f32.mxu0 %v1121_v7  ;;  %648 = vmatprep.mubr.f32.mxu1 %v1121_v7  ;;  %s937_s8 = sshll.u32 %s204_s7, 4  ;;  %s955_s9 = sshll.u32 %s1169_s19, 8 }
  0x28   : > { %s1385_s23 = smov (!%p208_p6, %s938_s23), 7  ;;  %v244_v10 = vsub.s32 0, %v243_v9  ;;  %v248_v11 = vsub.s32 4, %v243_v9  ;;  %v312_v14 = vsub.s32 1, %v243_v9  ;;  %v316_v15 = vsub.s32 5, %v243_v9  ;;  %s206_s10 = scalar_lea.vmem [#allocation5], %s937_s8 }
  0x29   : > { %s939_s27 = sshll.u32 %s1385_s23, 2  ;;  %v396_v22 = vsub.s32 2, %v243_v9  ;;  %v400_v23 = vsub.s32 6, %v243_v9  ;;  %s860_s11 = sshll.u32 %s206_s10, 4  ;;  %s861_s11 = int_to_ptr.vmem [resolvable:$true] %s860_s11 }
  0x2a   : > { %1013 = vset.pattern.permute.xlu0 %v1119_v3  ;;  %1015 = vset.pattern.permute.xlu1 %v1119_v3  ;;  %s211_s30 = scalar_lea.vmem %s1371_s0, %s939_s27  ;;  %s1336_s14 = scalar_lea.hbm %s1375_s4, %s955_s9 }
  0x2b   : > { %307 = vperm.xlu0 %1013, %v219_v1   ;;  %303 = vperm.xlu1 %1015, %v218_v2   ;;  %v214_v12 = vld [vmem:[%s211_s30] sm:$0x77]  ;;  %v215_v13 = vld [vmem:[%s211_s30 + $0x8] sm:$0x77]  ;;  %s846_s20 = scalar_lea.sflag [#allocation4], %s204_s7  ;;  %s1049_s22 = scalar_lea.vmem %s861_s11, 256 }
  0x2c   : > { %v245_v16 = vrot.slane %v214_v12, %v244_v10  ;;  %v249_v17 = vrot.slane %v214_v12, %v248_v11  ;;  %v253_v18 = vrot.slane %v215_v13, %v244_v10  ;;  %v257_v19 = vrot.slane %v215_v13, %v248_v11  ;;  %p1050_p8 = scmp.ne.s32.totalorder %s861_s11, %s1049_s22  ;;  %s1122_s19 = smov [#allocation5]  }
  0x2d   : > { %v313_v24 = vrot.slane %v214_v12, %v312_v14  ;;  %v317_v25 = vrot.slane %v214_v12, %v316_v15  ;;  %v321_v26 = vrot.slane %v215_v13, %v312_v14  ;;  %v325_v27 = vrot.slane %v215_v13, %v316_v15  ;;  %s1053_s23 = sshll.u32 %s1122_s19, 4  ;;  %s1054_s23 = int_to_ptr.vmem [resolvable:$false] %s1053_s23 }
  0x2e   : > { %v1232_v28 = vrot.slane %v245_v16, %v244_v10  ;;  %v1234_v29 = vrot.slane %v249_v17, %v244_v10  ;;  %v1236_v30 = vrot.slane %v253_v18, %v244_v10  ;;  %v1238_v31 = vrot.slane %v257_v19, %v244_v10  ;;  %p1051_p9 = pnand %p1050_p8, %p1186_p5  ;;  %s1055_s27 = scalar_lea.vmem %s1054_s23, 512 }
  0x2f   : > { %1017 = vset.pattern.permute.xlu0 %v1118_v0  ;;  %1016 = vset.pattern.permute.xlu1 %v1120_v5  ;;  %v401_v32 = vrot.slane %v214_v12, %v400_v23  ;;  %v409_v33 = vrot.slane %v215_v13, %v400_v23  ;;  %v397_v34 = vrot.slane %v214_v12, %v396_v22  ;;  %p1056_p11 = scmp.lt.s32.totalorder %s861_s11, %s1054_s23  ;;  %p1057_p12 = scmp.lt.s32.totalorder %s1055_s27, %s1049_s22 }
  0x30   : > { %391 = vperm.xlu1 %1016, %v219_v1   ;;  %227 = vperm.xlu0 %1017, %v217_v4   ;;  %v405_v35 = vrot.slane %v215_v13, %v396_v22  ;;  %v1240_v37 = vrot.slane %v313_v24, %v312_v14  ;;  %v1242_v38 = vrot.slane %v317_v25, %v312_v14  ;;  %p1052_p10 = pneg %p1051_p9 }
  0x31   : > { %v1244_v39 = vrot.slane %v321_v26, %v312_v14  ;;  %v1246_v40 = vrot.slane %v325_v27, %v312_v14  ;;  %v1256_v50 = vrot.slane %v401_v32, %v396_v22  ;;  %v1258_v51 = vrot.slane %v409_v33, %v396_v22  ;;  %p1058_p13 = por %p1057_p12, %p1056_p11 }
  0x32   : > { %v1260_v52 = vrot.slane %v397_v34, %v396_v22  ;;  %v1262_v53 = vrot.slane %v405_v35, %v396_v22 }
  0x33   : > { %p1059_p0 = pnand %p1058_p13, %p1052_p10 }
  0x34   : > { %1018 = vset.pattern.permute.xlu1 %v1119_v3  ;;  %222 = vperm.xlu0 %1017, %v216_v6  }
  0x35   : > { %299 = vperm.xlu1 %1018, %v217_v4  }
  0x38   : > { %1021 = vset.pattern.permute.xlu0 %v1120_v5 }
  0x39   : > { %1019 = vset.pattern.permute.xlu1 %v1120_v5  ;;  %383 = vperm.xlu0 %1021, %v217_v4  }
  0x3a   : > { %387 = vperm.xlu1 %1019, %v218_v2  }
  0x3e   : > { %1020 = vset.pattern.permute.xlu1 %v1119_v3 }
  0x3f   : > { %295 = vperm.xlu1 %1020, %v216_v6  }
  0x43   : > { %1022 = vset.pattern.permute.xlu1 %v1120_v5 }
  0x44   : > { %379 = vperm.xlu1 %1022, %v216_v6  }
  0xa1   : > { %v233_v20 = vpop.permute.xlu1 %232  ;;  %v238_v21 = vpop.permute.xlu0 %237 }
  0xa2   : > { %v290_v42 = vmul.f32 %v1232_v28, %v238_v21  ;;  %v292_v43 = vmul.f32 %v1236_v30, %v238_v21  ;;  %v291_v44 = vmul.f32 %v1234_v29, %v238_v21  ;;  %v293_v45 = vmul.f32 %v1238_v31, %v238_v21 }
  0xa3   : > { %v286_v2 = vmul.f32 %v1232_v28, %v233_v20  ;;  %v287_v3 = vmul.f32 %v1234_v29, %v233_v20  ;;  %v288_v4 = vmul.f32 %v1236_v30, %v233_v20  ;;  %v289_v5 = vmul.f32 %v1238_v31, %v233_v20 }
  0xa6   : > { %v304_v36 = vpop.permute.xlu1 %303  ;;  %v308_v41 = vpop.permute.xlu0 %307 }
  0xa7   : > { %v358_v46 = vmul.f32 %v1240_v37, %v308_v41  ;;  %v360_v47 = vmul.f32 %v1244_v39, %v308_v41  ;;  %v359_v48 = vmul.f32 %v1242_v38, %v308_v41  ;;  %v361_v49 = vmul.f32 %v1246_v40, %v308_v41 }
  0xa8   : > { %v355_v60 = vmul.f32 %v1242_v38, %v304_v36  ;;  %v357_v61 = vmul.f32 %v1246_v40, %v304_v36  ;;  %v354_v12 = vmul.f32 %v1240_v37, %v304_v36  ;;  %v356_v13 = vmul.f32 %v1244_v39, %v304_v36 }
  0xa9   : > { %v375_v56 = vadd.f32 %v359_v48, %v291_v44  ;;  %v377_v57 = vadd.f32 %v361_v49, %v293_v45  ;;  %v374_v58 = vadd.f32 %v358_v46, %v290_v42  ;;  %v376_v59 = vadd.f32 %v360_v47, %v292_v43 }
  0xaa   : > { %v371_v16 = vadd.f32 %v355_v60, %v287_v3  ;;  %v373_v20 = vadd.f32 %v357_v61, %v289_v5  ;;  %v370_v34 = vadd.f32 %v354_v12, %v286_v2  ;;  %v372_v35 = vadd.f32 %v356_v13, %v288_v4 }
  0xab   : > { %v392_v54 = vpop.permute.xlu1 %391  ;;  %v228_v55 = vpop.permute.xlu0 %227 }
  0xac   : > { %v443_v62 = vmul.f32 %v1256_v50, %v392_v54  ;;  %v445_v63 = vmul.f32 %v1258_v51, %v392_v54  ;;  %v442_v0 = vmul.f32 %v1260_v52, %v392_v54  ;;  %v444_v1 = vmul.f32 %v1262_v53, %v392_v54 }
  0xad   : > { %v283_v14 = vmul.f32 %v1234_v29, %v228_v55  ;;  %v282_v17 = vmul.f32 %v1232_v28, %v228_v55  ;;  %v284_v18 = vmul.f32 %v1236_v30, %v228_v55  ;;  %v285_v25 = vmul.f32 %v1238_v31, %v228_v55 }
  0xae   : > { %v459_v8 = vadd.f32 %v443_v62, %v375_v56  ;;  %v461_v9 = vadd.f32 %v445_v63, %v377_v57  ;;  %v458_v10 = vadd.f32 %v442_v0, %v374_v58  ;;  %v460_v11 = vadd.f32 %v444_v1, %v376_v59 }
  0xaf   : > { %v1274_v6 = vpop.permute.xlu0 %222 }
  0xb0   : > { %v300_v15 = vpop.permute.xlu1 %299  ;;  %v475_v21 = vmax.f32 %v459_v8, 0.0  ;;  %v477_v22 = vmax.f32 %v461_v9, 0.0  ;;  %v474_v23 = vmax.f32 %v458_v10, 0.0  ;;  %v476_v24 = vmax.f32 %v460_v11, 0.0 }
  0xb1   : > { %v351_v19 = vmul.f32 %v1242_v38, %v300_v15  ;;  %v350_v26 = vmul.f32 %v1240_v37, %v300_v15  ;;  %v352_v27 = vmul.f32 %v1244_v39, %v300_v15  ;;  %v353_v32 = vmul.f32 %v1246_v40, %v300_v15 }
  0xb2   : > { %519 = vmatprep.subr.mxu0 %v475_v21  ;;  %608 = vmatprep.subr.mxu1 %v477_v22  ;;  %v279_v11 = vmul.f32 %v1234_v29, %v1274_v6  ;;  %v280_v15 = vmul.f32 %v1236_v30, %v1274_v6 }
  0xb3   : > { %v367_v36 = vadd.f32 %v351_v19, %v283_v14  ;;  %520 = vmatpush1.msra.mxu0 %v474_v23  ;;  %609 = vmatpush1.msra.mxu1 %v476_v24  ;;  %v369_v54 = vadd.f32 %v353_v32, %v285_v25  ;;  %v366_v55 = vadd.f32 %v350_v26, %v282_v17  ;;  %v478_v32 = vld [vmem:[#allocation2] sm:$0xff] }
  0xb4   : > { %v384_v33 = vpop.permute.xlu0 %383  ;;  %v368_v56 = vadd.f32 %v352_v27, %v284_v18  ;;  %v278_v14 = vmul.f32 %v1232_v28, %v1274_v6 }
  0xb5   : > { %v434_v41 = vmul.f32 %v1260_v52, %v384_v33  ;;  %v435_v42 = vmul.f32 %v1256_v50, %v384_v33  ;;  %v436_v43 = vmul.f32 %v1262_v53, %v384_v33  ;;  %v388_v44 = vpop.permute.xlu1 %387  ;;  %v437_v45 = vmul.f32 %v1258_v51, %v384_v33 }
  0xb6   : > { %v438_v46 = vmul.f32 %v1260_v52, %v388_v44  ;;  %v439_v47 = vmul.f32 %v1256_v50, %v388_v44  ;;  %v440_v48 = vmul.f32 %v1262_v53, %v388_v44  ;;  %v441_v49 = vmul.f32 %v1258_v51, %v388_v44 }
  0xb7   : > { %v451_v60 = vadd.f32 %v435_v42, %v367_v36  ;;  %v450_v62 = vadd.f32 %v434_v41, %v366_v55  ;;  %v452_v63 = vadd.f32 %v436_v43, %v368_v56  ;;  %v453_v4 = vadd.f32 %v437_v45, %v369_v54 }
  0xb8   : > { %v455_v57 = vadd.f32 %v439_v47, %v371_v16  ;;  %v454_v58 = vadd.f32 %v438_v46, %v370_v34  ;;  %v456_v59 = vadd.f32 %v440_v48, %v372_v35  ;;  %v457_v61 = vadd.f32 %v441_v49, %v373_v20 }
  0xb9   : > { %v467_v13 = vmax.f32 %v451_v60, 0.0  ;;  %v468_v16 = vmax.f32 %v452_v63, 0.0 }
  0xba   : > { %v296_v0 = vpop.permute.xlu1 %295  ;;  %v471_v1 = vmax.f32 %v455_v57, 0.0  ;;  %v470_v2 = vmax.f32 %v454_v58, 0.0  ;;  %v472_v3 = vmax.f32 %v456_v59, 0.0  ;;  %v473_v12 = vmax.f32 %v457_v61, 0.0 }
  0xbb   : > { %v346_v5 = vmul.f32 %v1240_v37, %v296_v0  ;;  %v347_v8 = vmul.f32 %v1242_v38, %v296_v0  ;;  %v348_v9 = vmul.f32 %v1244_v39, %v296_v0  ;;  %v349_v10 = vmul.f32 %v1246_v40, %v296_v0 }
  0xbc   : > { %521 = vmatprep.subr.mxu0 %v471_v1  ;;  %v281_v37 = vmul.f32 %v1238_v31, %v1274_v6  ;;  %v466_v38 = vmax.f32 %v450_v62, 0.0  ;;  %610 = vmatprep.subr.mxu1 %v473_v12  ;;  %v469_v39 = vmax.f32 %v453_v4, 0.0 }
  0xbd   : > { %522 = vmatpush1.msra.mxu0 %v470_v2  ;;  %v363_v40 = vadd.f32 %v347_v8, %v279_v11  ;;  %611 = vmatpush1.msra.mxu1 %v472_v3  ;;  %v362_v18 = vadd.f32 %v346_v5, %v278_v14  ;;  %v364_v19 = vadd.f32 %v348_v9, %v280_v15  ;;  %v689_v9 = vld [vmem:[%s1374_s3] sm:$0xf] }
  0xbe   : > { %523 = vmatprep.subr.mxu0 %v467_v13  ;;  %v365_v17 = vadd.f32 %v349_v10, %v281_v37  ;;  %612 = vmatprep.subr.mxu1 %v469_v39 }
  0xbf   : > { %v380_v29 = vpop.permute.xlu1 %379  ;;  %524 = vmatpush1.msra.mxu0 %v466_v38  ;;  %613 = vmatpush1.msra.mxu1 %v468_v16 }
  0xc0   : > { %v430_v28 = vmul.f32 %v1260_v52, %v380_v29  ;;  %v431_v30 = vmul.f32 %v1256_v50, %v380_v29  ;;  %v432_v31 = vmul.f32 %v1262_v53, %v380_v29  ;;  %v433_v6 = vmul.f32 %v1258_v51, %v380_v29  ;;  %v479_v50 = vld [vmem:[#allocation2 + $0x8] sm:$0xff]  ;;  %v480_v51 = vld [vmem:[#allocation2 + $0x10] sm:$0xff]  ;;  %v481_v52 = vld [vmem:[#allocation2 + $0x18] sm:$0xff] }
  0xc2   : > { %v447_v20 = vadd.f32 %v431_v30, %v363_v40  ;;  %v449_v21 = vadd.f32 %v433_v6, %v365_v17  ;;  %v446_v22 = vadd.f32 %v430_v28, %v362_v18  ;;  %v448_v23 = vadd.f32 %v432_v31, %v364_v19 }
  0xc4   : > { %v463_v24 = vmax.f32 %v447_v20, 0.0  ;;  %v465_v25 = vmax.f32 %v449_v21, 0.0  ;;  %v462_v26 = vmax.f32 %v446_v22, 0.0  ;;  %v464_v27 = vmax.f32 %v448_v23, 0.0 }
  0xc6   : > { %525 = vmatprep.subr.mxu0 %v463_v24  ;;  %614 = vmatprep.subr.mxu1 %v465_v25 }
  0xc7   : > { %526 = vmatpush1.msra.mxu0 %v462_v26  ;;  %615 = vmatpush1.msra.mxu1 %v464_v27 }
  0xc8   : > { %940 = vmatmul.mubr.msk.f32.vlgmr.msra.gmra.mxu0 %vm482_vm0, %v478_v32  ;;  %944 = vmatmul.mubr.msk.f32.vlgmr.msra.gmra.mxu1 %vm482_vm0, %v478_v32 }
  0xc9   : > { %565 = vmatprep.mubr.f32.mxu0 %v1121_v7  ;;  %654 = vmatprep.mubr.f32.mxu1 %v1121_v7 }
  0xcc   : > { %941 = vmatmul.mubr.msk.f32.gmra.mxu0 %vm482_vm0, %v479_v50  ;;  %945 = vmatmul.mubr.msk.f32.gmra.mxu1 %vm482_vm0, %v479_v50 }
  0xcd   : > { %571 = vmatprep.mubr.f32.mxu0 %v1121_v7  ;;  %660 = vmatprep.mubr.f32.mxu1 %v1121_v7 }
  0xd0   : > { %942 = vmatmul.mubr.msk.f32.gmra.mxu0 %vm482_vm0, %v480_v51  ;;  %946 = vmatmul.mubr.msk.f32.gmra.mxu1 %vm482_vm0, %v480_v51 }
  0xd1   : > { %577 = vmatprep.mubr.f32.mxu0 %v1121_v7  ;;  %666 = vmatprep.mubr.f32.mxu1 %v1121_v7 }
  0xd4   : > { %943 = vmatmul.mubr.msk.f32.gmra.mxu0 %vm482_vm0, %v481_v52  ;;  %947 = vmatmul.mubr.msk.f32.gmra.mxu1 %vm482_vm0, %v481_v52 }
  0xd5   : > { %757 = vmatprep.mubr.f32.mxu0 %v1121_v7  ;;  %828 = vmatprep.mubr.f32.mxu1 %v1121_v7 }
 0x188   : > { %v561_v53 = vpop.f32.mrf.mxu0  ;;  %v650_v33 = vpop.f32.mrf.mxu1 }
 0x189   : > { %v673_v5 = vmax.f32 %v561_v53, 0.0  ;;  %v675_v8 = vmax.f32 %v650_v33, 0.0 }
 0x18a   : > { %v563_v34 = vpop.f32.mrf.mxu0  ;;  %v652_v35 = vpop.f32.mrf.mxu1 }
 0x18b   : > { %v674_v3 = vmax.f32 %v563_v34, 0.0  ;;  %v676_v4 = vmax.f32 %v652_v35, 0.0 }
 0x18c   : > { %v567_v36 = vpop.f32.mrf.mxu0  ;;  %v656_v41 = vpop.f32.mrf.mxu1 }
 0x18d   : > { %v677_v1 = vmax.f32 %v567_v36, 0.0  ;;  %v679_v2 = vmax.f32 %v656_v41, 0.0 }
 0x18e   : > { %v569_v42 = vpop.f32.mrf.mxu0  ;;  %v658_v43 = vpop.f32.mrf.mxu1 }
 0x18f   : > { %v678_v63 = vmax.f32 %v569_v42, 0.0  ;;  %v680_v0 = vmax.f32 %v658_v43, 0.0 }
 0x190   : > { %v573_v44 = vpop.f32.mrf.mxu0  ;;  %v662_v45 = vpop.f32.mrf.mxu1 }
 0x191   : > { %v681_v61 = vmax.f32 %v573_v44, 0.0  ;;  %v683_v62 = vmax.f32 %v662_v45, 0.0 }
 0x192   : > { %v575_v46 = vpop.f32.mrf.mxu0  ;;  %v664_v47 = vpop.f32.mrf.mxu1 }
 0x193   : > { %v682_v59 = vmax.f32 %v575_v46, 0.0  ;;  %v684_v60 = vmax.f32 %v664_v47, 0.0 }
 0x194   : > { %v579_v48 = vpop.f32.mrf.mxu0  ;;  %v668_v49 = vpop.f32.mrf.mxu1 }
 0x195   : > { %v685_v58 = vmax.f32 %v579_v48, 0.0  ;;  %v687_v7 = vmax.f32 %v668_v49, 0.0 }
 0x196   : > { %v581_v54 = vpop.f32.mrf.mxu0  ;;  %v670_v55 = vpop.f32.mrf.mxu1 }
 0x197   : > { %v686_v56 = vmax.f32 %v581_v54, 0.0  ;;  %v688_v57 = vmax.f32 %v670_v55, 0.0 }
 0x199   : > { %717 = vmatprep.subr.mxu0 %v686_v56  ;;  %788 = vmatprep.subr.mxu1 %v688_v57 }
 0x19a   : > { %718 = vmatpush1.msra.mxu0 %v685_v58  ;;  %789 = vmatpush1.msra.mxu1 %v687_v7 }
 0x19b   : > { %719 = vmatprep.subr.mxu0 %v682_v59  ;;  %790 = vmatprep.subr.mxu1 %v684_v60 }
 0x19c   : > { %720 = vmatpush1.msra.mxu0 %v681_v61  ;;  %791 = vmatpush1.msra.mxu1 %v683_v62 }
 0x19d   : > { %721 = vmatprep.subr.mxu0 %v678_v63  ;;  %792 = vmatprep.subr.mxu1 %v680_v0 }
 0x19e   : > { %722 = vmatpush1.msra.mxu0 %v677_v1  ;;  %793 = vmatpush1.msra.mxu1 %v679_v2 }
 0x19f   : > { %723 = vmatprep.subr.mxu0 %v674_v3  ;;  %794 = vmatprep.subr.mxu1 %v676_v4 }
 0x1a0   : > { %724 = vmatpush1.msra.mxu0 %v673_v5  ;;  %795 = vmatpush1.msra.mxu1 %v675_v8 }
 0x1a1   : > { %948 = vmatmul.mubr.msk.f32.vlgmr.msra.gmra.mxu0 %vm482_vm0, %v689_v9  ;;  %949 = vmatmul.mubr.msk.f32.vlgmr.msra.gmra.mxu1 %vm482_vm0, %v689_v9 }
 0x261   : > { %v759_v10 = vpop.f32.mrf.mxu0  ;;  %v830_v11 = vpop.f32.mrf.mxu1 }
 0x263   : > { %v761_v12 = vpop.f32.mrf.mxu0  ;;  %v832_v13 = vpop.f32.mrf.mxu1 }
 0x264   : > { %v839_v14 = vcombine.low %v759_v10, %v761_v12  ;;  %v840_v15 = vcombine.low %v830_v11, %v832_v13 }
 0x266   : > { %843 = vst [vmem:[%s206_s10] sm:$0xff] %v839_v14  ;;  %844 = vst [vmem:[%s206_s10 + $0x8] sm:$0xff] %v840_v15 }
 0x267   : > { %1062 = shalt.err (!%p1059_p0)
}
 0x268   : > { %s1063_s28 = scalar_lea.hbm %s1336_s14, 256  ;;  %s1067_s5 = scalar_lea.hbm %s1375_s4, 512 }
 0x269   : > { %p1064_p1 = scmp.ne.s32.totalorder %s1336_s14, %s1063_s28  ;;  %p1068_p4 = scmp.lt.s32.totalorder %s1336_s14, %s1375_s4 }
 0x26a   : > { %p1069_p7 = scmp.lt.s32.totalorder %s1067_s5, %s1063_s28 }
 0x26b   : > { %p1065_p2 = pnand %p1064_p1, %p1186_p5 }
 0x26c   : > { %p1070_p6 = por %p1069_p7, %p1068_p4 }
 0x26d   : > { %p1066_p3 = pneg %p1065_p2 }
 0x26f   : > { %p1071_p8 = pnand %p1070_p6, %p1066_p3 }
 0x271   : > { %1074 = shalt.err (!%p1071_p8)
}
 0x272   : > { %960 = dma.vmem_to_hbm [thread:$0]  (%p1186_p5), %s861_s11, 256, %s1336_s14, %s846_s20  }
 0x273 PF: > { %p972_p9 = scmp.ge.s32.totalorder %s1113_s18, 2  ;;  %s872_s8 = sand.u32 1, %s1101_s15  }
 0x274   : > { %p1379_p10 = scmp.ne.s32.totalorder %s1377_s26, 0  ;;  %s873_s9 = scalar_lea.sflag [#allocation4], %s872_s8 }
 0x276   : > { %p967_p11 = pnand %p972_p9, %p1379_p10 }
 0x278   : > { %p968_p12 = pneg %p967_p11 }
 0x27a   : > { %1096 = dma.done.wait (%p968_p12), %s873_s9, 256  }
 0x27b   : > { %1098 = vsyncadd (%p968_p12), %s873_s9, 4294967040  ;;  %p15_p13 = scmp.ge.s32.totalorder %s1173_s21, 4   ;;  %s1380_s15 = smov %s1105_s16 }
 0x27c   : > { %s1381_s16 = smov %s1109_s17  ;;  %s1382_s17 = smov %s1184_s24 }
 0x27d   : > { %s1383_s18 = smov %s1173_s21  ;;  %17 = sbr.rel (!%p15_p13) target bundleno = 4 (0x4), region = 76 }
 0x282   :  { %878 = vsyncpa [#allocation3], 1 }
 0x283   :  { %880 = vsyncpa [#allocation3 + $0x1], 1 }
 0x284   :  { %881 = vsyncpa [#allocation4], 1 }
 0x285   :  { %883 = vsyncpa [#allocation4 + $0x1], 1 }

</bundles_post_ra>
